<compile_context>
chip_gen: v7x
topology: tpu7x:2x2x1
jax: 0.10.0
libtpu: 0.0.40
codegen_flags: <defaults>
</compile_context>

<pallas_src>
import functools

import jax
import jax.numpy as jnp
from jax import lax
from jax.experimental import pallas as pl
from jax.experimental.pallas import tpu as pltpu


def _round_up(x: int, m: int) -> int:
    return ((x + m - 1) // m) * m


def _linear_seq_kernel(x_ref, w1_ref, b1_ref, w2_ref, b2_ref, o_ref):
    # x_ref: (TM, D_in); w1_ref: (D_mid, D_in); b1_ref: (1, D_mid)
    # w2_ref: (D_out, D_mid); b2_ref: (1, D_out); o_ref: (TM, D_out)
    x = x_ref[...]

    # a = x @ W1.T  (contract last dim of x with last dim of W1) -> (TM, D_mid)
    a = lax.dot_general(
        x, w1_ref[...],
        dimension_numbers=(((1,), (1,)), ((), ())),
        preferred_element_type=jnp.float32,
    )
    a = a + b1_ref[...].astype(jnp.float32)

    # b = a @ W2.T — keep `a` in f32 for the second MXU pass (no precision drop).
    b = lax.dot_general(
        a, w2_ref[...],
        dimension_numbers=(((1,), (1,)), ((), ())),
        preferred_element_type=jnp.float32,
    )
    b = b + b2_ref[...].astype(jnp.float32)

    o_ref[...] = b.astype(o_ref.dtype)


@functools.partial(jax.jit, static_argnames=("tm",))
def linear_sequential(x, w1, b1, w2, b2, *, tm: int | None = None):
    """x: (B, input_size); w1: (inter, input); b1: (inter,);
    w2: (out, inter); b2: (out,). Returns (B, out)."""
    B, d_in = x.shape
    d_mid = w1.shape[0]
    d_out = w2.shape[0]
    itemsize = jnp.dtype(x.dtype).itemsize

    # --- batch tile: sublane-aligned (>=8 for f32); big tiles when B is big ---
    if tm is None:
        tm = 256 if B >= 256 else _round_up(max(B, 1), 8)
    tm = min(tm, _round_up(B, 8))
    b_pad = _round_up(B, tm)
    if b_pad != B:
        x = jnp.pad(x, ((0, b_pad - B), (0, 0)))

    # Biases as (1, D) rows for clean broadcast inside the kernel (no data move).
    b1_2d = b1.reshape(1, d_mid)
    b2_2d = b2.reshape(1, d_out)

    grid = (b_pad // tm,)

    # Weights/biases: whole-array blocks, same block index every step -> loaded
    # once and kept VMEM-resident. x/out: tiled over batch -> double-buffered.
    in_specs = [
        pl.BlockSpec((tm, d_in), lambda i: (i, 0)),        # x tile
        pl.BlockSpec((d_mid, d_in), lambda i: (0, 0)),     # W1 (resident)
        pl.BlockSpec((1, d_mid), lambda i: (0, 0)),        # b1 (resident)
        pl.BlockSpec((d_out, d_mid), lambda i: (0, 0)),    # W2 (resident)
        pl.BlockSpec((1, d_out), lambda i: (0, 0)),        # b2 (resident)
    ]
    out_specs = pl.BlockSpec((tm, d_out), lambda i: (i, 0))

    # --- VMEM budget: only raise the scoped limit when actually needed ---------
    resident_bytes = (w1.size + w2.size + b1.size + b2.size) * itemsize
    tile_bytes = 2 * (tm * d_in + tm * d_out) * itemsize   # double-buffered x/out
    interm_bytes = tm * d_mid * 4                          # f32 intermediate
    need = resident_bytes + tile_bytes + interm_bytes
    cp_kwargs = dict(dimension_semantics=("parallel",))
    if need > 24 * 1024 * 1024:
        # leave headroom below the physical VMEM of the smallest target (v7x 64 MiB)
        cp_kwargs["vmem_limit_bytes"] = int(min(2 * need, 56 * 1024 * 1024))
    compiler_params = pltpu.CompilerParams(**cp_kwargs)

    cost = pl.CostEstimate(
        flops=2 * b_pad * d_in * d_mid + 2 * b_pad * d_mid * d_out,
        transcendentals=0,
        bytes_accessed=(b_pad * d_in + d_mid * d_in + d_mid
                        + d_out * d_mid + d_out + b_pad * d_out) * itemsize,
    )

    out = pl.pallas_call(
        _linear_seq_kernel,
        out_shape=jax.ShapeDtypeStruct((b_pad, d_out), x.dtype),
        grid=grid,
        in_specs=in_specs,
        out_specs=out_specs,
        compiler_params=compiler_params,
        cost_estimate=cost,
    )(x, w1, b1_2d, w2, b2_2d)

    return out[:B] if b_pad != B else out


if __name__ == "__main__":
    # Module defaults: in_size=2, input_size=4, intermediate_size=5, output_size=3
    in_size, input_size, intermediate_size, output_size = 2, 4, 5, 3

    key = jax.random.PRNGKey(0)
    k_x, k_w1, k_b1, k_w2, k_b2 = jax.random.split(key, 5)

    # Deterministic "torch.rand"-style init: uniform [0, 1), float32.
    x = jax.random.uniform(k_x, (in_size, input_size), dtype=jnp.float32)
    w1 = jax.random.uniform(k_w1, (intermediate_size, input_size), dtype=jnp.float32)
    b1 = jax.random.uniform(k_b1, (intermediate_size,), dtype=jnp.float32)
    w2 = jax.random.uniform(k_w2, (output_size, intermediate_size), dtype=jnp.float32)
    b2 = jax.random.uniform(k_b2, (output_size,), dtype=jnp.float32)

    out = linear_sequential(x, w1, b1, w2, b2)
    jax.block_until_ready(out)

    # Reference check in plain JAX (PyTorch F.linear semantics).
    ref = (x @ w1.T + b1) @ w2.T + b2
    assert out.shape == (in_size, output_size)
    assert jnp.allclose(out, ref, atol=1e-5, rtol=1e-5)

    # Also exercise a larger, tile-crossing batch to validate the grid path.
    big_B = 300  # not a multiple of the tile -> exercises pad + slice
    xb = jax.random.uniform(jax.random.PRNGKey(1), (big_B, input_size), dtype=jnp.float32)
    out_b = linear_sequential(xb, w1, b1, w2, b2)
    jax.block_until_ready(out_b)
    ref_b = (xb @ w1.T + b1) @ w2.T + b2
    assert out_b.shape == (big_B, output_size)
    assert jnp.allclose(out_b, ref_b, atol=1e-4, rtol=1e-5)

    print("KERNEL_OK")
</pallas_src>

<mosaic_0001>
module attributes {stable_mosaic.version = 11 : i64} {
  func.func @_linear_seq_kernel(%arg0: i32, %arg1: memref<8x4xf32, #tpu.memory_space<vmem>>, %arg2: memref<5x4xf32, #tpu.memory_space<vmem>>, %arg3: memref<1x5xf32, #tpu.memory_space<vmem>>, %arg4: memref<3x5xf32, #tpu.memory_space<vmem>>, %arg5: memref<1x3xf32, #tpu.memory_space<vmem>>, %arg6: memref<8x3xf32, #tpu.memory_space<vmem>>) attributes {dimension_semantics = [#tpu.dimension_semantics<parallel>], iteration_bounds = array<i64: 1>, scalar_prefetch = 0 : i64, scratch_operands = 0 : i64, tpu.core_type = #tpu.core_type<tc>, window_params = [{transform_indices = @transform_0, window_bounds = array<i64: 8, 4>}, {pipeline_mode = #tpu.pipeline_mode<synchronous>, transform_indices = @transform_1, window_bounds = array<i64: 5, 4>}, {pipeline_mode = #tpu.pipeline_mode<synchronous>, transform_indices = @transform_2, window_bounds = array<i64: 1, 5>}, {pipeline_mode = #tpu.pipeline_mode<synchronous>, transform_indices = @transform_3, window_bounds = array<i64: 3, 5>}, {pipeline_mode = #tpu.pipeline_mode<synchronous>, transform_indices = @transform_4, window_bounds = array<i64: 1, 3>}, {transform_indices = @transform_5, window_bounds = array<i64: 8, 3>}]} {
    %c0 = arith.constant 0 : index
    %c0_0 = arith.constant 0 : index
    %0 = vector.load %arg1[%c0, %c0_0] : memref<8x4xf32, #tpu.memory_space<vmem>>, vector<8x4xf32>
    %c0_1 = arith.constant 0 : index
    %c0_2 = arith.constant 0 : index
    %1 = vector.load %arg2[%c0_1, %c0_2] : memref<5x4xf32, #tpu.memory_space<vmem>>, vector<5x4xf32>
    %cst = arith.constant dense<0.000000e+00> : vector<8x5xf32>
    %2 = tpu.matmul %0, %1, %cst {dimension_numbers = #tpu.dot_dimension_numbers<[1], [1], [0], [0], [0, 0, 1, 0], [], []>} : vector<8x4xf32>, vector<5x4xf32>, vector<8x5xf32> -> vector<8x5xf32>
    %c0_3 = arith.constant 0 : index
    %c0_4 = arith.constant 0 : index
    %3 = vector.load %arg3[%c0_3, %c0_4] : memref<1x5xf32, #tpu.memory_space<vmem>>, vector<1x5xf32>
    %4 = vector.broadcast %3 : vector<1x5xf32> to vector<8x5xf32>
    %5 = arith.addf %2, %4 : vector<8x5xf32>
    %c0_5 = arith.constant 0 : index
    %c0_6 = arith.constant 0 : index
    %6 = vector.load %arg4[%c0_5, %c0_6] : memref<3x5xf32, #tpu.memory_space<vmem>>, vector<3x5xf32>
    %cst_7 = arith.constant dense<0.000000e+00> : vector<8x3xf32>
    %7 = tpu.matmul %5, %6, %cst_7 {dimension_numbers = #tpu.dot_dimension_numbers<[1], [1], [0], [0], [0, 0, 1, 0], [], []>} : vector<8x5xf32>, vector<3x5xf32>, vector<8x3xf32> -> vector<8x3xf32>
    %c0_8 = arith.constant 0 : index
    %c0_9 = arith.constant 0 : index
    %8 = vector.load %arg5[%c0_8, %c0_9] : memref<1x3xf32, #tpu.memory_space<vmem>>, vector<1x3xf32>
    %9 = vector.broadcast %8 : vector<1x3xf32> to vector<8x3xf32>
    %10 = arith.addf %7, %9 : vector<8x3xf32>
    %c0_10 = arith.constant 0 : index
    %c0_11 = arith.constant 0 : index
    %11 = vector.load %arg6[%c0_10, %c0_11] : memref<8x3xf32, #tpu.memory_space<vmem>>, vector<8x3xf32>
    tpu.vector_store %arg6[%c0_10, %c0_11], %10 {strides = array<i32>} : memref<8x3xf32, #tpu.memory_space<vmem>>, vector<8x3xf32>,
    return
  }
  func.func @transform_0(%arg0: i32) -> (i32, i32) {
    %c0_i32 = arith.constant 0 : i32
    %c0_i32_0 = arith.constant 0 : i32
    return %arg0, %c0_i32 : i32, i32
  }
  func.func @transform_1(%arg0: i32) -> (i32, i32) {
    %c0_i32 = arith.constant 0 : i32
    %c0_i32_0 = arith.constant 0 : i32
    %c0_i32_1 = arith.constant 0 : i32
    return %c0_i32, %c0_i32_0 : i32, i32
  }
  func.func @transform_2(%arg0: i32) -> (i32, i32) {
    %c0_i32 = arith.constant 0 : i32
    %c0_i32_0 = arith.constant 0 : i32
    %c0_i32_1 = arith.constant 0 : i32
    return %c0_i32, %c0_i32_0 : i32, i32
  }
  func.func @transform_3(%arg0: i32) -> (i32, i32) {
    %c0_i32 = arith.constant 0 : i32
    %c0_i32_0 = arith.constant 0 : i32
    %c0_i32_1 = arith.constant 0 : i32
    return %c0_i32, %c0_i32_0 : i32, i32
  }
  func.func @transform_4(%arg0: i32) -> (i32, i32) {
    %c0_i32 = arith.constant 0 : i32
    %c0_i32_0 = arith.constant 0 : i32
    %c0_i32_1 = arith.constant 0 : i32
    return %c0_i32, %c0_i32_0 : i32, i32
  }
  func.func @transform_5(%arg0: i32) -> (i32, i32) {
    %c0_i32 = arith.constant 0 : i32
    %c0_i32_0 = arith.constant 0 : i32
    return %arg0, %c0_i32 : i32, i32
  }
}

</mosaic_0001>

<bundles_post_ra>
// kernel: linear_sequential.1
= control target key start
LH: loop header
LB: loop body
LE: loop exit
PB: predicated region body
PF: predicated region fallthrough
CT: control target
= control target key end

     0   :  { %vm29_vm0 = vcmask 31744   ;;  %v219_v0 = vmov 0.0   ;;  %vm220_vm1 = vmmov 0   ;;  %vm114_vm2 = vcmask 39936   ;;  %s269_s1 = inlined_call_operand.vmem [shape: f32[5,4], index: 1, kind: input, shape index: {}]   ;;  %s270_s0 = inlined_call_operand.vmem [shape: f32[8,4], index: 0, kind: input, shape index: {}]   ;;  %s271_s3 = inlined_call_operand.vmem [shape: f32[3,5], index: 3, kind: input, shape index: {}]   ;;  %s272_s2 = inlined_call_operand.vmem [shape: f32[1,5], index: 2, kind: input, shape index: {}]   ;;  %s273_s4 = inlined_call_operand.vmem [shape: f32[1,3], index: 4, kind: input, shape index: {}]   ;;  %s274_s5 = inlined_call_operand.vmem [shape: f32[8,3], index: 5, kind: output, shape index: {}]  }
   0x1   :  { %207 = vmatprep.subr.mxu0 %v219_v0  ;;  %v21_v1 = vld [vmem:[%s269_s1] sm:$0x1f]  ;;  %209 = vmatprep.mubr.msk.f32.mxu0 %vm220_vm1, %v219_v0  ;;  %vm191_vm3 = vcmask 23552  }
   0x2   :  { %208 = vmatpush3.xpose.msk.msra.mxu0 %vm29_vm0, %v21_v1  ;;  %v20_v2 = vld [vmem:[%s270_s0] sm:$0xff]  ;;  %212 = vmatprep.subr.mxu1 %v219_v0 }
   0x3   :  { %214 = vmatprep.mubr.msk.f32.mxu1 %vm220_vm1, %v219_v0  ;;  %v106_v3 = vld [vmem:[%s271_s3] sm:$0x7] }
   0x4   :  { %213 = vmatpush3.xpose.msk.msra.mxu1 %vm114_vm2, %v106_v3  ;;  %v197_v4 = vld [vmem:[%s272_s2] ss:$0 sm:$0xff] }
   0x5   :  { %210 = vmatmul.mubr.msk.f32.vlgmr.msra.gmra.mrb[0].mxu0 %vm29_vm0, %v20_v2  ;;  %v200_v8 = vld [vmem:[%s273_s4] ss:$0 sm:$0xff] }
  0xd8   :  { %v102_v5 = vpop.f32.mrb[0].mxu0 }
  0xd9   :  { %v103_v6 = vadd.f32 %v197_v4, %v102_v5  ;;  %v211_v7 = vpop.f32.mrb[1].mxu0 }
  0xdb   :  { %215 = vmatmul.mubr.msk.f32.vlgmr.msra.gmra.mrb[0].mxu1 %vm114_vm2, %v103_v6 }
 0x1ae   :  { %v187_v9 = vpop.f32.mrb[0].mxu1 }
 0x1af   :  { %v188_v10 = vadd.f32 %v200_v8, %v187_v9  ;;  %v216_v11 = vpop.f32.mrb[1].mxu1 }
 0x1b1   :  { %192 = vst.msk [vmem:[%s274_s5] sm:$0xff] %vm191_vm3, %v188_v10 }

</bundles_post_ra>
